<compile_context>
chip_gen: v7x
topology: tpu7x:2x2x1
jax: 0.10.0
libtpu: 0.0.40
codegen_flags: <defaults>
</compile_context>

<pallas_src>
import functools

import jax
import jax.numpy as jnp
from jax.experimental import pallas as pl
from jax.experimental.pallas import tpu as pltpu

_LANE = 128       # lane width (last-dim vector unit width)
_MAX_TILE_B = 512  # batch rows per grid step (multiple of 8 sublanes)
_SMALL_K = 8      # contractions at/below this K go through the VPU, not the MXU


def _round_up(x: int, m: int) -> int:
    return ((x + m - 1) // m) * m


def _make_critic_kernel(layer_sizes, out_lanes, use_vpu_last):
    """Build a kernel for an MLP with the given per-layer sizes.

    layer_sizes: (in, h0, h1, ..., out) -- static Python ints.
    out_lanes:   lane-padded width of the output block (>= layer_sizes[-1]).
    use_vpu_last: if True, the last weight is passed pre-transposed as (1, K)
                  and the last layer is a VPU multiply + XLU lane-reduce.
    """
    num_layers = len(layer_sizes) - 1
    out_size = layer_sizes[-1]

    def kernel(*refs):
        # refs = (x_ref, w0, b0, w1, b1, ..., wL, bL, out_ref)
        x_ref = refs[0]
        out_ref = refs[-1]
        wb = refs[1:-1]

        h = x_ref[...].astype(jnp.float32)

        for layer in range(num_layers):
            w_ref = wb[2 * layer]
            b_ref = wb[2 * layer + 1]
            k_dim = layer_sizes[layer]
            is_last = layer == num_layers - 1

            if k_dim <= _SMALL_K:
                # Tiny contraction (e.g. K=2 for MountainCar obs): VPU
                # outer-product accumulate -- skips an MXU push/pop round-trip.
                w = w_ref[...]                 # (k_dim, n)
                acc = jnp.broadcast_to(b_ref[...], (h.shape[0], w.shape[1]))
                for k in range(k_dim):
                    acc = acc + h[:, k:k + 1] * w[k:k + 1, :]
                h = acc
            elif is_last and use_vpu_last:
                # N == 1 output: w_ref holds W^T with shape (1, K).
                # VPU multiply + XLU cross-lane reduce instead of MXU.
                h = jnp.sum(h * w_ref[...], axis=-1, keepdims=True) + b_ref[...]
            else:
                h = (
                    jnp.dot(h, w_ref[...], preferred_element_type=jnp.float32)
                    + b_ref[...]
                )

            if not is_last:
                h = jnp.maximum(h, 0.0)  # ReLU on hidden layers only

        # Lane-dense store: the output block's last dim is padded to 128.
        if out_lanes > out_size:
            if out_size == 1:
                out_ref[...] = jnp.broadcast_to(h, out_ref.shape).astype(
                    out_ref.dtype
                )
            else:
                pad = jnp.zeros((h.shape[0], out_lanes - out_size), dtype=h.dtype)
                out_ref[...] = jnp.concatenate([h, pad], axis=-1).astype(
                    out_ref.dtype
                )
        else:
            out_ref[...] = h.astype(out_ref.dtype)

    return kernel


@jax.jit
def critic_forward(state, params):
    """Critic MLP forward pass in a single Pallas TPU kernel.

    state:  (batch, input_size) float32  -- batch many env states per call.
    params: list of (W, b) with W (in, out) and b (1, out), all float32.
    returns (batch, output_size) float32
    """
    num_layers = len(params)
    batch, in_size = state.shape
    layer_sizes = tuple([in_size] + [w.shape[1] for w, _ in params])
    out_size = layer_sizes[-1]

    # Lane-padded output width (multiple of 128) -> unmasked stores.
    out_lanes = _round_up(out_size, _LANE)

    # Batch tile: whole batch if small, else 512-row tiles (multiple of 8
    # sublanes) sharded across TensorCores via the "parallel" grid axis.
    tile_b = batch if batch <= _MAX_TILE_B else _MAX_TILE_B
    grid = (pl.cdiv(batch, tile_b),)

    # Use the VPU path for the last layer iff it is a real (K>8) -> 1 reduce.
    use_vpu_last = out_size == 1 and layer_sizes[-2] > _SMALL_K

    flat_inputs = [state]
    for li, (w, b) in enumerate(params):
        if li == num_layers - 1 and use_vpu_last:
            flat_inputs.append(w.T)  # (1, K) row, lane-major for the VPU reduce
        else:
            flat_inputs.append(w)
        flat_inputs.append(b)

    in_specs = [pl.BlockSpec((tile_b, in_size), lambda i: (i, 0))]
    for arr in flat_inputs[1:]:
        # Full-array (untiled) blocks for every weight/bias, replicated per step.
        in_specs.append(pl.BlockSpec(arr.shape, lambda i: (0, 0)))
    out_specs = pl.BlockSpec((tile_b, out_lanes), lambda i: (i, 0))

    flops = 2 * batch * sum(
        layer_sizes[i] * layer_sizes[i + 1] for i in range(num_layers)
    )
    bytes_accessed = (
        state.size * 4
        + sum(int(a.size) * 4 for a in flat_inputs[1:])
        + batch * out_lanes * 4
    )
    cost = pl.CostEstimate(
        flops=flops, transcendentals=0, bytes_accessed=bytes_accessed
    )

    kernel = _make_critic_kernel(layer_sizes, out_lanes, use_vpu_last)

    out_padded = pl.pallas_call(
        kernel,
        grid=grid,
        out_shape=jax.ShapeDtypeStruct((batch, out_lanes), jnp.float32),
        in_specs=in_specs,
        out_specs=out_specs,
        compiler_params=pltpu.CompilerParams(
            dimension_semantics=("parallel",)
        ),
        cost_estimate=cost,
    )(*flat_inputs)

    return out_padded[:, :out_size]


def init_critic_params(key, input_size, h_layers_sizes, output_size):
    """nn.Linear-style init (U[-1/sqrt(fan_in), 1/sqrt(fan_in)]).

    Weights are pre-transposed to (in, out); biases shaped (1, out).
    """
    sizes = [input_size] + list(h_layers_sizes) + [output_size]
    params = []
    for i in range(len(sizes) - 1):
        fan_in, fan_out = sizes[i], sizes[i + 1]
        key, kw, kb = jax.random.split(key, 3)
        bound = 1.0 / jnp.sqrt(jnp.float32(fan_in))
        w = jax.random.uniform(
            kw, (fan_in, fan_out), jnp.float32, minval=-bound, maxval=bound
        )
        b = jax.random.uniform(
            kb, (1, fan_out), jnp.float32, minval=-bound, maxval=bound
        )
        params.append((w, b))
    return params


def critic_forward_ref(state, params):
    """Pure-JAX reference for correctness checking."""
    h = state
    for i, (w, b) in enumerate(params):
        h = h @ w + b
        if i < len(params) - 1:
            h = jnp.maximum(h, 0.0)
    return h


if __name__ == "__main__":
    # MountainCar-v0: observation dim = 2, critic output = 1 value.
    input_size = 2
    h_layers_sizes = [32, 32]
    output_size = 1
    # Batch many environment states per call to amortize launch/DMA overhead
    # (the per-call fixed cost dominates any in-kernel compute at these sizes).
    batch = 64

    key = jax.random.PRNGKey(0)
    key, k_state = jax.random.split(key)
    state = jax.random.normal(k_state, (batch, input_size), dtype=jnp.float32)

    params = init_critic_params(key, input_size, h_layers_sizes, output_size)

    value = jax.block_until_ready(critic_forward(state, params))

    value_ref = critic_forward_ref(state, params)
    assert value.shape == (batch, output_size)
    assert jnp.allclose(value, value_ref, atol=1e-5, rtol=1e-5), (
        f"mismatch: max err {jnp.max(jnp.abs(value - value_ref))}"
    )

    # TODO(synk): further wins require fusing the critic into the full RL-step
    # kernel (actor + TD target) rather than optimizing this forward in isolation.
    print("KERNEL_OK")
</pallas_src>

<mosaic_0001>
module attributes {stable_mosaic.version = 11 : i64} {
  func.func @kernel(%arg0: i32, %arg1: memref<64x2xf32, #tpu.memory_space<vmem>>, %arg2: memref<2x32xf32, #tpu.memory_space<vmem>>, %arg3: memref<1x32xf32, #tpu.memory_space<vmem>>, %arg4: memref<32x32xf32, #tpu.memory_space<vmem>>, %arg5: memref<1x32xf32, #tpu.memory_space<vmem>>, %arg6: memref<1x32xf32, #tpu.memory_space<vmem>>, %arg7: memref<1x1xf32, #tpu.memory_space<vmem>>, %arg8: memref<64x128xf32, #tpu.memory_space<vmem>>) attributes {dimension_semantics = [#tpu.dimension_semantics<parallel>], iteration_bounds = array<i64: 1>, scalar_prefetch = 0 : i64, scratch_operands = 0 : i64, tpu.core_type = #tpu.core_type<tc>, window_params = [{transform_indices = @transform_0, window_bounds = array<i64: 64, 2>}, {pipeline_mode = #tpu.pipeline_mode<synchronous>, transform_indices = @transform_1, window_bounds = array<i64: 2, 32>}, {pipeline_mode = #tpu.pipeline_mode<synchronous>, transform_indices = @transform_2, window_bounds = array<i64: 1, 32>}, {pipeline_mode = #tpu.pipeline_mode<synchronous>, transform_indices = @transform_3, window_bounds = array<i64: 32, 32>}, {pipeline_mode = #tpu.pipeline_mode<synchronous>, transform_indices = @transform_4, window_bounds = array<i64: 1, 32>}, {pipeline_mode = #tpu.pipeline_mode<synchronous>, transform_indices = @transform_5, window_bounds = array<i64: 1, 32>}, {pipeline_mode = #tpu.pipeline_mode<synchronous>, transform_indices = @transform_6, window_bounds = array<i64: 1, 1>}, {transform_indices = @transform_7, window_bounds = array<i64: 64, 128>}]} {
    %c0 = arith.constant 0 : index
    %c0_0 = arith.constant 0 : index
    %0 = vector.load %arg1[%c0, %c0_0] : memref<64x2xf32, #tpu.memory_space<vmem>>, vector<64x2xf32>
    %c0_1 = arith.constant 0 : index
    %c0_2 = arith.constant 0 : index
    %1 = vector.load %arg2[%c0_1, %c0_2] : memref<2x32xf32, #tpu.memory_space<vmem>>, vector<2x32xf32>
    %c0_3 = arith.constant 0 : index
    %c0_4 = arith.constant 0 : index
    %2 = vector.load %arg3[%c0_3, %c0_4] : memref<1x32xf32, #tpu.memory_space<vmem>>, vector<1x32xf32>
    %3 = vector.shape_cast %2 : vector<1x32xf32> to vector<1x32xf32>
    %4 = vector.broadcast %3 : vector<1x32xf32> to vector<64x32xf32>
    %5 = vector.extract_strided_slice %0 {offsets = [0, 0], sizes = [64, 1], strides = [1, 1]} : vector<64x2xf32> to vector<64x1xf32>
    %6 = vector.extract_strided_slice %1 {offsets = [0, 0], sizes = [1, 32], strides = [1, 1]} : vector<2x32xf32> to vector<1x32xf32>
    %7 = vector.broadcast %5 : vector<64x1xf32> to vector<64x32xf32>
    %8 = vector.broadcast %6 : vector<1x32xf32> to vector<64x32xf32>
    %9 = arith.mulf %7, %8 : vector<64x32xf32>
    %10 = arith.addf %4, %9 : vector<64x32xf32>
    %11 = vector.extract_strided_slice %0 {offsets = [0, 1], sizes = [64, 1], strides = [1, 1]} : vector<64x2xf32> to vector<64x1xf32>
    %12 = vector.extract_strided_slice %1 {offsets = [1, 0], sizes = [1, 32], strides = [1, 1]} : vector<2x32xf32> to vector<1x32xf32>
    %13 = vector.broadcast %11 : vector<64x1xf32> to vector<64x32xf32>
    %14 = vector.broadcast %12 : vector<1x32xf32> to vector<64x32xf32>
    %15 = arith.mulf %13, %14 : vector<64x32xf32>
    %16 = arith.addf %10, %15 : vector<64x32xf32>
    %cst = arith.constant 0.000000e+00 : f32
    %17 = vector.broadcast %cst : f32 to vector<64x32xf32>
    %18 = arith.maximumf %16, %17 : vector<64x32xf32>
    %c0_5 = arith.constant 0 : index
    %c0_6 = arith.constant 0 : index
    %19 = vector.load %arg4[%c0_5, %c0_6] : memref<32x32xf32, #tpu.memory_space<vmem>>, vector<32x32xf32>
    %cst_7 = arith.constant dense<0.000000e+00> : vector<64x32xf32>
    %20 = tpu.matmul %18, %19, %cst_7 {dimension_numbers = #tpu.dot_dimension_numbers<[1], [0], [0], [1], [0, 0, 1, 1], [], []>} : vector<64x32xf32>, vector<32x32xf32>, vector<64x32xf32> -> vector<64x32xf32>
    %c0_8 = arith.constant 0 : index
    %c0_9 = arith.constant 0 : index
    %21 = vector.load %arg5[%c0_8, %c0_9] : memref<1x32xf32, #tpu.memory_space<vmem>>, vector<1x32xf32>
    %22 = vector.broadcast %21 : vector<1x32xf32> to vector<64x32xf32>
    %23 = arith.addf %20, %22 : vector<64x32xf32>
    %cst_10 = arith.constant 0.000000e+00 : f32
    %24 = vector.broadcast %cst_10 : f32 to vector<64x32xf32>
    %25 = arith.maximumf %23, %24 : vector<64x32xf32>
    %c0_11 = arith.constant 0 : index
    %c0_12 = arith.constant 0 : index
    %26 = vector.load %arg6[%c0_11, %c0_12] : memref<1x32xf32, #tpu.memory_space<vmem>>, vector<1x32xf32>
    %27 = vector.broadcast %26 : vector<1x32xf32> to vector<64x32xf32>
    %28 = arith.mulf %25, %27 : vector<64x32xf32>
    %cst_13 = arith.constant dense<0.000000e+00> : vector<64xf32>
    %29 = vector.multi_reduction <add>, %28, %cst_13 [1] : vector<64x32xf32> to vector<64xf32>
    %30 = vector.shape_cast %29 : vector<64xf32> to vector<64x1xf32>
    %c0_14 = arith.constant 0 : index
    %c0_15 = arith.constant 0 : index
    %31 = vector.load %arg7[%c0_14, %c0_15] : memref<1x1xf32, #tpu.memory_space<vmem>>, vector<1x1xf32>
    %32 = vector.broadcast %31 : vector<1x1xf32> to vector<64x1xf32>
    %33 = arith.addf %30, %32 : vector<64x1xf32>
    %34 = vector.shape_cast %33 : vector<64x1xf32> to vector<64x1xf32>
    %35 = vector.broadcast %34 : vector<64x1xf32> to vector<64x128xf32>
    %c0_16 = arith.constant 0 : index
    %c0_17 = arith.constant 0 : index
    %36 = vector.load %arg8[%c0_16, %c0_17] : memref<64x128xf32, #tpu.memory_space<vmem>>, vector<64x128xf32>
    tpu.vector_store %arg8[%c0_16, %c0_17], %35 {strides = array<i32>} : memref<64x128xf32, #tpu.memory_space<vmem>>, vector<64x128xf32>,
    return
  }
  func.func @transform_0(%arg0: i32) -> (i32, i32) {
    %c0_i32 = arith.constant 0 : i32
    %c0_i32_0 = arith.constant 0 : i32
    return %arg0, %c0_i32 : i32, i32
  }
  func.func @transform_1(%arg0: i32) -> (i32, i32) {
    %c0_i32 = arith.constant 0 : i32
    %c0_i32_0 = arith.constant 0 : i32
    %c0_i32_1 = arith.constant 0 : i32
    return %c0_i32, %c0_i32_0 : i32, i32
  }
  func.func @transform_2(%arg0: i32) -> (i32, i32) {
    %c0_i32 = arith.constant 0 : i32
    %c0_i32_0 = arith.constant 0 : i32
    %c0_i32_1 = arith.constant 0 : i32
    return %c0_i32, %c0_i32_0 : i32, i32
  }
  func.func @transform_3(%arg0: i32) -> (i32, i32) {
    %c0_i32 = arith.constant 0 : i32
    %c0_i32_0 = arith.constant 0 : i32
    %c0_i32_1 = arith.constant 0 : i32
    return %c0_i32, %c0_i32_0 : i32, i32
  }
  func.func @transform_4(%arg0: i32) -> (i32, i32) {
    %c0_i32 = arith.constant 0 : i32
    %c0_i32_0 = arith.constant 0 : i32
    %c0_i32_1 = arith.constant 0 : i32
    return %c0_i32, %c0_i32_0 : i32, i32
  }
  func.func @transform_5(%arg0: i32) -> (i32, i32) {
    %c0_i32 = arith.constant 0 : i32
    %c0_i32_0 = arith.constant 0 : i32
    %c0_i32_1 = arith.constant 0 : i32
    return %c0_i32, %c0_i32_0 : i32, i32
  }
  func.func @transform_6(%arg0: i32) -> (i32, i32) {
    %c0_i32 = arith.constant 0 : i32
    %c0_i32_0 = arith.constant 0 : i32
    %c0_i32_1 = arith.constant 0 : i32
    return %c0_i32, %c0_i32_0 : i32, i32
  }
  func.func @transform_7(%arg0: i32) -> (i32, i32) {
    %c0_i32 = arith.constant 0 : i32
    %c0_i32_0 = arith.constant 0 : i32
    return %arg0, %c0_i32 : i32, i32
  }
}

</mosaic_0001>

<bundles_post_ra>
// kernel: critic_forward.1
= control target key start
LH: loop header
LB: loop body
LE: loop exit
PB: predicated region body
PF: predicated region fallthrough
CT: control target
= control target key end

     0   :  { %v485_v0 = vmov 0   ;;  %v486_v6 = vmov 1   ;;  %v84_v16 = vlaneseq  ;;  %vm175_vm0 = vcmask 261120   ;;  %s618_s0 = inlined_call_operand.vmem [shape: f32[64,2], index: 0, kind: input, shape index: {}]   ;;  %s619_s3 = inlined_call_operand.vmem [shape: f32[32,32], index: 3, kind: input, shape index: {}]   ;;  %s620_s1 = inlined_call_operand.vmem [shape: f32[2,32], index: 1, kind: input, shape index: {}]   ;;  %s621_s2 = inlined_call_operand.vmem [shape: f32[1,32], index: 2, kind: input, shape index: {}]   ;;  %s622_s6 = inlined_call_operand.<no memory space> [shape: f32[1,1], index: 6, kind: input, shape index: {}]   ;;  %s623_s4 = inlined_call_operand.vmem [shape: f32[1,32], index: 4, kind: input, shape index: {}]   ;;  %s624_s5 = inlined_call_operand.vmem [shape: f32[1,32], index: 5, kind: input, shape index: {}]   ;;  %s625_s7 = inlined_call_operand.vmem [shape: f32[64,128], index: 7, kind: output, shape index: {}]  }
   0x1   :  { %478 = vset.pattern.permute.xlu1 %v485_v0  ;;  %477 = vset.pattern.permute.xlu0 %v485_v0  ;;  %v29_v1 = vld [vmem:[%s618_s0 + $0x8] sm:$0xff]  ;;  %v28_v2 = vld [vmem:[%s618_s0] sm:$0xff]  ;;  %v34_v5 = vld [vmem:[%s618_s0 + $0x30] sm:$0xff] }
   0x2   :  { %51 = vperm.xlu1 %478, %v29_v1   ;;  %46 = vperm.xlu0 %477, %v28_v2   ;;  %v33_v3 = vld [vmem:[%s618_s0 + $0x28] sm:$0xff]  ;;  %v32_v4 = vld [vmem:[%s618_s0 + $0x20] sm:$0xff]  ;;  %v166_v10 = vld [vmem:[%s619_s3 + $0x10] sm:$0xff]  ;;  %v85_v17 = vshrl.u32 %v84_v16, 7  ;;  %v12_v16 = vstv %s622_s6 }
   0x3   :  { %v164_v7 = vld [vmem:[%s619_s3] sm:$0xff]  ;;  %v165_v8 = vld [vmem:[%s619_s3 + $0x8] sm:$0xff]  ;;  %v167_v11 = vld [vmem:[%s619_s3 + $0x18] sm:$0xff]  ;;  %13 = vst [vmem:[#allocation2] sm:$0x1] %v12_v16 }
   0x4   :  { %v463_v9 = vpack.c.bf16 %v165_v8, %v164_v7  ;;  %v467_v12 = vpack.c.bf16 %v167_v11, %v166_v10  ;;  %v30_v13 = vld [vmem:[%s618_s0 + $0x10] sm:$0xff]  ;;  %v31_v14 = vld [vmem:[%s618_s0 + $0x18] sm:$0xff]  ;;  %v86_v18 = vsub.s32 0, %v85_v17  ;;  %v36_v19 = vld [vmem:[%s620_s1] sm:$0x3]  ;;  %v138_v22 = vsub.s32 1, %v85_v17 }
   0x5   :  { %v35_v15 = vld [vmem:[%s618_s0 + $0x38] sm:$0xff]  ;;  %v419_v28 = vld [vmem:[%s621_s2] ss:$0 sm:$0xff] }
   0x6   :  { %71 = vperm.xlu1 %478, %v33_v3   ;;  %66 = vperm.xlu0 %477, %v32_v4   ;;  %v87_v23 = vrot.slane %v36_v19, %v86_v18  ;;  %v139_v27 = vrot.slane %v36_v19, %v138_v22  ;;  %v420_v17 = vld [vmem:[%s623_s4] ss:$0 sm:$0xff] }
   0x7   :  { %464 = vmatprep.subr.bf16.mxu0 %v463_v9  ;;  %471 = vmatprep.subr.bf16.mxu1 %v463_v9  ;;  %v429_v22 = vld [vmem:[%s624_s5] ss:$0 sm:$0xff] }
   0x8   :  { %466 = vmatpush3.bf16.msra.mxu0 %v463_v9  ;;  %473 = vmatpush3.bf16.msra.mxu1 %v463_v9 }
   0x9   :  { %468 = vmatprep.subr.bf16.mxu0 %v467_v12  ;;  %472 = vmatprep.subr.bf16.mxu1 %v467_v12 }
   0xa   :  { %479 = vset.pattern.permute.xlu1 %v486_v6  ;;  %76 = vperm.xlu0 %477, %v34_v5  }
   0xb   :  { %121 = vperm.xlu1 %479, %v32_v4  }
   0xc   :  { %470 = vmatpush3.bf16.msra.mxu0 %v467_v12  ;;  %474 = vmatpush3.bf16.msra.mxu1 %v467_v12 }
   0xe   :  { %481 = vset.pattern.permute.xlu0 %v486_v6 }
   0xf   :  { %109 = vperm.xlu1 %479, %v29_v1   ;;  %105 = vperm.xlu0 %481, %v28_v2  }
  0x13   :  { %480 = vset.pattern.permute.xlu1 %v485_v0  ;;  %125 = vperm.xlu0 %481, %v33_v3  }
  0x14   :  { %56 = vperm.xlu1 %480, %v30_v13  }
  0x17   :  { %113 = vperm.xlu0 %481, %v30_v13  }
  0x18   :  { %61 = vperm.xlu1 %480, %v31_v14  }
  0x1b   :  { %133 = vperm.xlu0 %481, %v35_v15  }
  0x1c   :  { %81 = vperm.xlu1 %480, %v35_v15  }
  0x1f   :  { %483 = vset.pattern.permute.xlu0 %v485_v0 }
  0x20   :  { %482 = vset.pattern.permute.xlu1 %v486_v6 }
  0x21   :  { %129 = vperm.xlu1 %482, %v34_v5  }
  0x25   :  { %117 = vperm.xlu1 %482, %v31_v14  }
  0x29   :  { %484 = vset.pattern.permute.xlu1 %v485_v0 }
  0x81   :  { %v52_v20 = vpop.permute.xlu1 %51  ;;  %v47_v21 = vpop.permute.xlu0 %46 }
  0x82   :  { %v89_v31 = vmul.f32 %v87_v23, %v52_v20  ;;  %v88_v32 = vmul.f32 %v87_v23, %v47_v21 }
  0x84   :  { %v97_v36 = vadd.f32 %v419_v28, %v89_v31  ;;  %v96_v37 = vadd.f32 %v419_v28, %v88_v32 }
  0x85   :  { %v72_v24 = vpop.permute.xlu1 %71  ;;  %v67_v25 = vpop.permute.xlu0 %66 }
  0x86   :  { %v92_v26 = vmul.f32 %v87_v23, %v67_v25  ;;  %v93_v40 = vmul.f32 %v87_v23, %v72_v24 }
  0x88   :  { %v100_v29 = vadd.f32 %v419_v28, %v92_v26  ;;  %v101_v47 = vadd.f32 %v419_v28, %v93_v40 }
  0x89   :  { %v77_v30 = vpop.permute.xlu0 %76 }
  0x8a   :  { %v122_v33 = vpop.permute.xlu1 %121  ;;  %v94_v63 = vmul.f32 %v87_v23, %v77_v30 }
  0x8b   :  { %v144_v34 = vmul.f32 %v139_v27, %v122_v33 }
  0x8c   :  { %v102_v4 = vadd.f32 %v419_v28, %v94_v63 }
  0x8d   :  { %v152_v35 = vadd.f32 %v144_v34, %v100_v29 }
  0x8e   :  { %v110_v38 = vpop.permute.xlu1 %109  ;;  %v106_v39 = vpop.permute.xlu0 %105 }
  0x8f   :  { %v141_v41 = vmul.f32 %v139_v27, %v110_v38  ;;  %v140_v42 = vmul.f32 %v139_v27, %v106_v39  ;;  %v160_v43 = vmax.f32 %v152_v35, 0.0 }
  0x91   :  { %v149_v44 = vadd.f32 %v141_v41, %v97_v36  ;;  %457 = vmatprep.mubr.msk.f32.mxu1 %vm175_vm0, %v160_v43  ;;  %v148_v45 = vadd.f32 %v140_v42, %v96_v37 }
  0x92   :  { %v126_v46 = vpop.permute.xlu0 %125 }
  0x93   :  { %v157_v48 = vmax.f32 %v149_v44, 0.0  ;;  %v145_v49 = vmul.f32 %v139_v27, %v126_v46  ;;  %v57_v50 = vpop.permute.xlu1 %56  ;;  %v156_v51 = vmax.f32 %v148_v45, 0.0 }
  0x94   :  { %v90_v52 = vmul.f32 %v87_v23, %v57_v50 }
  0x95   :  { %v153_v53 = vadd.f32 %v145_v49, %v101_v47  ;;  %451 = vmatprep.mubr.msk.f32.mxu0 %vm175_vm0, %v156_v51 }
  0x96   :  { %v98_v54 = vadd.f32 %v419_v28, %v90_v52  ;;  %452 = vmatmul.mubr.msk.f32.vlgmr.msra.gmra.mrb[0].mxu0 %vm175_vm0, %v157_v48  ;;  %v114_v55 = vpop.permute.xlu0 %113 }
  0x97   :  { %v161_v56 = vmax.f32 %v153_v53, 0.0  ;;  %v142_v57 = vmul.f32 %v139_v27, %v114_v55  ;;  %v62_v58 = vpop.permute.xlu1 %61 }
  0x98   :  { %v91_v5 = vmul.f32 %v87_v23, %v62_v58 }
  0x99   :  { %v150_v59 = vadd.f32 %v142_v57, %v98_v54  ;;  %458 = vmatmul.mubr.msk.f32.vlgmr.msra.gmra.mrb[0].mxu1 %vm175_vm0, %v161_v56 }
  0x9a   :  { %v134_v0 = vpop.permute.xlu0 %133  ;;  %v99_v10 = vadd.f32 %v419_v28, %v91_v5 }
  0x9b   :  { %v158_v60 = vmax.f32 %v150_v59, 0.0  ;;  %v82_v61 = vpop.permute.xlu1 %81  ;;  %v147_v2 = vmul.f32 %v139_v27, %v134_v0  ;;  %v430_v59 = vld [vmem:[#allocation2] ss:$0 sm:$0xff] }
  0x9c   :  { %v95_v62 = vmul.f32 %v87_v23, %v82_v61 }
  0x9d   :  { %454 = vmatprep.mubr.msk.f32.mxu0 %vm175_vm0, %v158_v60 }
  0x9e   :  { %v103_v1 = vadd.f32 %v419_v28, %v95_v62 }
  0xa0   :  { %v130_v3 = vpop.permute.xlu1 %129  ;;  %v155_v7 = vadd.f32 %v147_v2, %v103_v1 }
  0xa1   :  { %v146_v6 = vmul.f32 %v139_v27, %v130_v3 }
  0xa2   :  { %v163_v13 = vmax.f32 %v155_v7, 0.0 }
  0xa3   :  { %v154_v8 = vadd.f32 %v146_v6, %v102_v4 }
  0xa4   :  { %v118_v9 = vpop.permute.xlu1 %117 }
  0xa5   :  { %v162_v11 = vmax.f32 %v154_v8, 0.0  ;;  %v143_v12 = vmul.f32 %v139_v27, %v118_v9 }
  0xa7   :  { %v151_v14 = vadd.f32 %v143_v12, %v99_v10  ;;  %460 = vmatprep.mubr.msk.f32.mxu1 %vm175_vm0, %v162_v11 }
  0xa8   :  { %461 = vmatmul.mubr.msk.f32.gmra.mrb[2].mxu1 %vm175_vm0, %v163_v13 }
  0xa9   :  { %v159_v15 = vmax.f32 %v151_v14, 0.0 }
  0xab   :  { %455 = vmatmul.mubr.msk.f32.gmra.mrb[2].mxu0 %vm175_vm0, %v159_v15 }
 0x169   :  { %v453_v18 = vpop.f32.mrb[0].mxu0 }
 0x16a   :  { %v272_v19 = vadd.f32 %v453_v18, %v420_v17  ;;  %v266_v20 = vpop.f32.mrb[1].mxu0 }
 0x16b   :  { %v267_v21 = vadd.f32 %v420_v17, %v266_v20 }
 0x16c   :  { %v306_v23 = vmax.f32 %v272_v19, 0.0  ;;  %v459_v24 = vpop.f32.mrb[0].mxu1 }
 0x16d   :  { %v292_v25 = vadd.f32 %v459_v24, %v420_v17  ;;  %v286_v26 = vpop.f32.mrb[1].mxu1  ;;  %v305_v29 = vmax.f32 %v267_v21, 0.0 }
 0x16e   :  { %v287_v27 = vadd.f32 %v420_v17, %v286_v26  ;;  %v321_v28 = vmul.f32 %v429_v22, %v306_v23 }
 0x16f   :  { %v310_v30 = vmax.f32 %v292_v25, 0.0  ;;  %v320_v36 = vmul.f32 %v429_v22, %v305_v29 }
 0x170   :  { %v309_v31 = vmax.f32 %v287_v27, 0.0  ;;  %v331_v32 = vsel %vm175_vm0, %v321_v28, 0.0 }
 0x171   :  { %332 = vadd.xlane.f32.xlu0 %v331_v32  ;;  %v325_v33 = vmul.f32 %v429_v22, %v310_v30  ;;  %v328_v38 = vsel %vm175_vm0, %v320_v36, 0.0 }
 0x172   :  { %v324_v34 = vmul.f32 %v429_v22, %v309_v31 }
 0x173   :  { %v343_v35 = vsel %vm175_vm0, %v325_v33, 0.0 }
 0x174   :  { %344 = vadd.xlane.f32.xlu1 %v343_v35  ;;  %v340_v37 = vsel %vm175_vm0, %v324_v34, 0.0 }
 0x175   :  { %341 = vadd.xlane.f32.xlu0 %v340_v37 }
 0x178   :  { %329 = vadd.xlane.f32.xlu1 %v328_v38 }
 0x17b   :  { %v462_v39 = vpop.f32.mrb[2].mxu1 }
 0x17c   :  { %v296_v40 = vpop.f32.mrb[3].mxu1  ;;  %v302_v41 = vadd.f32 %v462_v39, %v420_v17 }
 0x17d   :  { %v297_v42 = vadd.f32 %v420_v17, %v296_v40 }
 0x17e   :  { %v456_v43 = vpop.f32.mrb[2].mxu0  ;;  %v312_v47 = vmax.f32 %v302_v41, 0.0 }
 0x17f   :  { %v282_v44 = vadd.f32 %v456_v43, %v420_v17  ;;  %v276_v45 = vpop.f32.mrb[3].mxu0  ;;  %v311_v49 = vmax.f32 %v297_v42, 0.0 }
 0x180   :  { %v277_v46 = vadd.f32 %v420_v17, %v276_v45  ;;  %v327_v54 = vmul.f32 %v429_v22, %v312_v47 }
 0x181   :  { %v308_v48 = vmax.f32 %v282_v44, 0.0  ;;  %v326_v56 = vmul.f32 %v429_v22, %v311_v49 }
 0x182   :  { %v307_v50 = vmax.f32 %v277_v46, 0.0  ;;  %v349_v57 = vsel %vm175_vm0, %v327_v54, 0.0 }
 0x183   :  { %v323_v51 = vmul.f32 %v429_v22, %v308_v48  ;;  %v346_v58 = vsel %vm175_vm0, %v326_v56, 0.0 }
 0x184   :  { %v322_v52 = vmul.f32 %v429_v22, %v307_v50 }
 0x185   :  { %v337_v53 = vsel %vm175_vm0, %v323_v51, 0.0 }
 0x186   :  { %338 = vadd.xlane.f32.xlu1 %v337_v53  ;;  %v334_v55 = vsel %vm175_vm0, %v322_v52, 0.0 }
 0x187   :  { %335 = vadd.xlane.f32.xlu0 %v334_v55 }
 0x18a   :  { %350 = vadd.xlane.f32.xlu1 %v349_v57 }
 0x18b   :  { %347 = vadd.xlane.f32.xlu0 %v346_v58 }
 0x1fe   :  { %v333_v60 = vpop.xlane.xlu0 %332 }
 0x1ff   :  { %v360_v61 = vadd.f32 %v430_v59, %v333_v60 }
 0x201   :  { %v345_v62 = vpop.xlane.xlu1 %344  ;;  %374 = vperm.xlu1 %484, %v360_v61  }
 0x202   :  { %v364_v63 = vadd.f32 %v430_v59, %v345_v62  ;;  %v342_v0 = vpop.xlane.xlu0 %341 }
 0x203   :  { %v363_v3 = vadd.f32 %v430_v59, %v342_v0 }
 0x205   :  { %v330_v1 = vpop.xlane.xlu1 %329  ;;  %394 = vperm.xlu1 %484, %v364_v63  }
 0x206   :  { %v359_v2 = vadd.f32 %v430_v59, %v330_v1 }
 0x208   :  { %369 = vperm.xlu0 %483, %v359_v2  }
 0x209   :  { %389 = vperm.xlu1 %484, %v363_v3  }
 0x213   :  { %v339_v4 = vpop.xlane.xlu1 %338 }
 0x214   :  { %v362_v5 = vadd.f32 %v430_v59, %v339_v4  ;;  %v336_v6 = vpop.xlane.xlu0 %335 }
 0x215   :  { %v361_v7 = vadd.f32 %v430_v59, %v336_v6 }
 0x216   :  { %384 = vperm.xlu1 %484, %v362_v5  }
 0x217   :  { %v351_v10 = vpop.xlane.xlu1 %350 }
 0x218   :  { %v348_v8 = vpop.xlane.xlu0 %347  ;;  %v366_v11 = vadd.f32 %v430_v59, %v351_v10 }
 0x219   :  { %v365_v9 = vadd.f32 %v430_v59, %v348_v8 }
 0x21a   :  { %379 = vperm.xlu1 %484, %v361_v7  }
 0x21e   :  { %399 = vperm.xlu1 %484, %v365_v9  }
 0x222   :  { %404 = vperm.xlu1 %484, %v366_v11  }
 0x280   :  { %v375_v12 = vpop.permute.xlu1 %374 }
 0x281   :  { %408 = vst [vmem:[%s625_s7 + $0x8] sm:$0xff] %v375_v12 }
 0x284   :  { %v395_v13 = vpop.permute.xlu1 %394 }
 0x285   :  { %412 = vst [vmem:[%s625_s7 + $0x28] sm:$0xff] %v395_v13 }
 0x287   :  { %v370_v14 = vpop.permute.xlu0 %369 }
 0x288   :  { %407 = vst [vmem:[%s625_s7] sm:$0xff] %v370_v14  ;;  %v390_v15 = vpop.permute.xlu1 %389 }
 0x289   :  { %411 = vst [vmem:[%s625_s7 + $0x20] sm:$0xff] %v390_v15 }
 0x295   :  { %v385_v16 = vpop.permute.xlu1 %384 }
 0x296   :  { %410 = vst [vmem:[%s625_s7 + $0x18] sm:$0xff] %v385_v16 }
 0x299   :  { %v380_v17 = vpop.permute.xlu1 %379 }
 0x29a   :  { %409 = vst [vmem:[%s625_s7 + $0x10] sm:$0xff] %v380_v17 }
 0x29d   :  { %v400_v18 = vpop.permute.xlu1 %399 }
 0x29e   :  { %413 = vst [vmem:[%s625_s7 + $0x30] sm:$0xff] %v400_v18 }
 0x2a1   :  { %v405_v19 = vpop.permute.xlu1 %404 }
 0x2a2   :  { %414 = vst [vmem:[%s625_s7 + $0x38] sm:$0xff] %v405_v19 }

</bundles_post_ra>
